<compile_context>
chip_gen: v7x
topology: tpu7x:2x2x1
jax: 0.10.0
libtpu: 0.0.40
codegen_flags: <defaults>
</compile_context>

<pallas_src>
import jax
import jax.numpy as jnp
from jax import lax
from jax.experimental import pallas as pl
from jax.experimental.pallas import tpu as pltpu


def _round_up(n, m):
    return ((n + m - 1) // m) * m


def _cdiv(a, b):
    return (a + b - 1) // b


def mlp_kernel(x_ref, w1_ref, b1_ref, w2_ref, b2_ref, w3t_ref, b3c_ref, o_ref):
    # fc1 + ReLU  (TB, 66) @ (66, 64) -> (TB, 64)
    h1 = jnp.dot(x_ref[...], w1_ref[...], preferred_element_type=jnp.float32)
    h1 = jnp.maximum(h1 + b1_ref[...], 0.0)
    # fc2 + ReLU  (TB, 64) @ (64, 32) -> (TB, 32)
    h2 = jnp.dot(h1, w2_ref[...], preferred_element_type=jnp.float32)
    h2 = jnp.maximum(h2 + b2_ref[...], 0.0)
    # fc3, computed transposed so the store is lane-dense:
    #   (2, 32) contracted with (TB, 32) on the 32-dim -> (2, TB)
    o_t = lax.dot_general(
        w3t_ref[...], h2,
        dimension_numbers=(((1,), (1,)), ((), ())),
        preferred_element_type=jnp.float32)
    o_ref[...] = (o_t + b3c_ref[...]).astype(o_ref.dtype)


def simple_nn_forward(x, params, *, block_batch=4096):
    """x: (B, 66) float32 -> (B, 2) float32."""
    w1, b1, w2, b2, w3, b3 = params
    B, F = x.shape

    # ---- Batch tile selection --------------------------------------------
    block_batch = max(128, _round_up(block_batch, 128))
    # Prefer >= 2 grid steps (v7x megacore balance on the "parallel" axis) ...
    tb = min(block_batch, max(128, _round_up(_cdiv(B, 2), 128)))
    # ... but never a tile larger than the (8-aligned) batch itself.
    tb = min(tb, _round_up(B, 8))
    grid_len = _cdiv(B, tb)        # ragged last x block handled by Pallas masking
    b_out = tb * grid_len          # output columns padded to whole blocks

    # Host-side (tiny) re-layout of the last layer's parameters.
    w3t = jnp.transpose(w3)                      # (2, 32)
    b3c = jnp.reshape(b3, (w3.shape[1], 1))      # (2, 1)

    # Advisory cost hint so XLA schedules/overlaps the custom call correctly.
    flops = 2 * B * (66 * 64 + 64 * 32 + 32 * 2)
    param_bytes = sum(int(p.size) * p.dtype.itemsize for p in params)
    bytes_accessed = B * (F + 2) * 4 + param_bytes

    # Weights/biases: full-array blocks with a constant block index -> DMA'd once,
    # VMEM-resident for the whole grid.
    resident = lambda a: pl.BlockSpec(a.shape, lambda i: (0, 0))

    out_t = pl.pallas_call(
        mlp_kernel,
        out_shape=jax.ShapeDtypeStruct((2, b_out), jnp.float32),
        grid=(grid_len,),
        in_specs=[
            pl.BlockSpec((tb, F), lambda i: (i, 0)),   # x: streamed per batch tile
            resident(w1), resident(b1),
            resident(w2), resident(b2),
            resident(w3t), resident(b3c),
        ],
        out_specs=pl.BlockSpec((2, tb), lambda i: (0, i)),  # lane-dense slab
        compiler_params=pltpu.CompilerParams(
            dimension_semantics=("parallel",),           # megacore sharding on v7x
            vmem_limit_bytes=32 * 1024 * 1024,           # covers v5e's 16 MiB default
        ),
        cost_estimate=pl.CostEstimate(
            flops=flops, transcendentals=0, bytes_accessed=bytes_accessed),
    )(x, w1, b1, w2, b2, w3t, b3c)

    # (2, b_out) -> (B, 2): ~16 B/row of extra traffic vs the 264 B/row x read.
    return out_t[:, :B].T


def init_params(key):
    """Deterministic init mirroring nn.Linear's default U(-1/sqrt(fan_in), +...)."""
    dims = [(66, 64), (64, 32), (32, 2)]
    params = []
    for fan_in, fan_out in dims:
        kw, kb, key = jax.random.split(key, 3)
        bound = 1.0 / jnp.sqrt(float(fan_in))
        # stored as (in, out) == transposed PyTorch (out, in) weight
        w = jax.random.uniform(kw, (fan_in, fan_out), jnp.float32, -bound, bound)
        b = jax.random.uniform(kb, (1, fan_out), jnp.float32, -bound, bound)
        params.extend([w, b])
    return tuple(params)


def reference_forward(x, params):
    w1, b1, w2, b2, w3, b3 = params
    hp = lax.Precision.HIGHEST
    h1 = jnp.maximum(jnp.dot(x, w1, precision=hp) + b1, 0.0)
    h2 = jnp.maximum(jnp.dot(h1, w2, precision=hp) + b2, 0.0)
    return jnp.dot(h2, w3, precision=hp) + b3


if __name__ == "__main__":
    key = jax.random.PRNGKey(0)
    kx, kx2, kp = jax.random.split(key, 3)
    params = init_params(kp)

    # Small batch: single block, block dims == full array dims.
    B = 8
    x = jax.random.normal(kx, (B, 66), jnp.float32)
    out = jax.block_until_ready(simple_nn_forward(x, params))
    ref = reference_forward(x, params)
    assert out.shape == (B, 2)
    # Tolerance allows for MXU matmul precision differences vs the XLA reference.
    assert jnp.allclose(out, ref, atol=5e-3, rtol=1e-3), "mismatch vs reference (B=8)"

    # Awkward batch: 2-step grid, ragged last x block, padded output columns.
    B2 = 2500
    x2 = jax.random.normal(kx2, (B2, 66), jnp.float32)
    out2 = jax.block_until_ready(simple_nn_forward(x2, params))
    ref2 = reference_forward(x2, params)
    assert out2.shape == (B2, 2)
    assert jnp.allclose(out2, ref2, atol=5e-3, rtol=1e-3), "mismatch vs reference (B=2500)"

    print("KERNEL_OK")
</pallas_src>

<mosaic_0001>
module attributes {stable_mosaic.version = 11 : i64} {
  func.func @mlp_kernel(%arg0: i32, %arg1: memref<8x66xf32, #tpu.memory_space<vmem>>, %arg2: memref<66x64xf32, #tpu.memory_space<vmem>>, %arg3: memref<1x64xf32, #tpu.memory_space<vmem>>, %arg4: memref<64x32xf32, #tpu.memory_space<vmem>>, %arg5: memref<1x32xf32, #tpu.memory_space<vmem>>, %arg6: memref<2x32xf32, #tpu.memory_space<vmem>>, %arg7: memref<2x1xf32, #tpu.memory_space<vmem>>, %arg8: memref<2x8xf32, #tpu.memory_space<vmem>>) attributes {dimension_semantics = [#tpu.dimension_semantics<parallel>], iteration_bounds = array<i64: 1>, scalar_prefetch = 0 : i64, scratch_operands = 0 : i64, tpu.core_type = #tpu.core_type<tc>, window_params = [{transform_indices = @transform_0, window_bounds = array<i64: 8, 66>}, {pipeline_mode = #tpu.pipeline_mode<synchronous>, transform_indices = @transform_1, window_bounds = array<i64: 66, 64>}, {pipeline_mode = #tpu.pipeline_mode<synchronous>, transform_indices = @transform_2, window_bounds = array<i64: 1, 64>}, {pipeline_mode = #tpu.pipeline_mode<synchronous>, transform_indices = @transform_3, window_bounds = array<i64: 64, 32>}, {pipeline_mode = #tpu.pipeline_mode<synchronous>, transform_indices = @transform_4, window_bounds = array<i64: 1, 32>}, {pipeline_mode = #tpu.pipeline_mode<synchronous>, transform_indices = @transform_5, window_bounds = array<i64: 2, 32>}, {pipeline_mode = #tpu.pipeline_mode<synchronous>, transform_indices = @transform_6, window_bounds = array<i64: 2, 1>}, {transform_indices = @transform_7, window_bounds = array<i64: 2, 8>}]} {
    %c0 = arith.constant 0 : index
    %c0_0 = arith.constant 0 : index
    %0 = vector.load %arg1[%c0, %c0_0] : memref<8x66xf32, #tpu.memory_space<vmem>>, vector<8x66xf32>
    %c0_1 = arith.constant 0 : index
    %c0_2 = arith.constant 0 : index
    %1 = vector.load %arg2[%c0_1, %c0_2] : memref<66x64xf32, #tpu.memory_space<vmem>>, vector<66x64xf32>
    %cst = arith.constant dense<0.000000e+00> : vector<8x64xf32>
    %2 = tpu.matmul %0, %1, %cst {dimension_numbers = #tpu.dot_dimension_numbers<[1], [0], [0], [1], [0, 0, 1, 1], [], []>} : vector<8x66xf32>, vector<66x64xf32>, vector<8x64xf32> -> vector<8x64xf32>
    %c0_3 = arith.constant 0 : index
    %c0_4 = arith.constant 0 : index
    %3 = vector.load %arg3[%c0_3, %c0_4] : memref<1x64xf32, #tpu.memory_space<vmem>>, vector<1x64xf32>
    %4 = vector.broadcast %3 : vector<1x64xf32> to vector<8x64xf32>
    %5 = arith.addf %2, %4 : vector<8x64xf32>
    %cst_5 = arith.constant 0.000000e+00 : f32
    %6 = vector.broadcast %cst_5 : f32 to vector<8x64xf32>
    %7 = arith.maximumf %5, %6 : vector<8x64xf32>
    %c0_6 = arith.constant 0 : index
    %c0_7 = arith.constant 0 : index
    %8 = vector.load %arg4[%c0_6, %c0_7] : memref<64x32xf32, #tpu.memory_space<vmem>>, vector<64x32xf32>
    %cst_8 = arith.constant dense<0.000000e+00> : vector<8x32xf32>
    %9 = tpu.matmul %7, %8, %cst_8 {dimension_numbers = #tpu.dot_dimension_numbers<[1], [0], [0], [1], [0, 0, 1, 1], [], []>} : vector<8x64xf32>, vector<64x32xf32>, vector<8x32xf32> -> vector<8x32xf32>
    %c0_9 = arith.constant 0 : index
    %c0_10 = arith.constant 0 : index
    %10 = vector.load %arg5[%c0_9, %c0_10] : memref<1x32xf32, #tpu.memory_space<vmem>>, vector<1x32xf32>
    %11 = vector.broadcast %10 : vector<1x32xf32> to vector<8x32xf32>
    %12 = arith.addf %9, %11 : vector<8x32xf32>
    %cst_11 = arith.constant 0.000000e+00 : f32
    %13 = vector.broadcast %cst_11 : f32 to vector<8x32xf32>
    %14 = arith.maximumf %12, %13 : vector<8x32xf32>
    %c0_12 = arith.constant 0 : index
    %c0_13 = arith.constant 0 : index
    %15 = vector.load %arg6[%c0_12, %c0_13] : memref<2x32xf32, #tpu.memory_space<vmem>>, vector<2x32xf32>
    %cst_14 = arith.constant dense<0.000000e+00> : vector<2x8xf32>
    %16 = tpu.matmul %15, %14, %cst_14 {dimension_numbers = #tpu.dot_dimension_numbers<[1], [1], [0], [0], [0, 0, 1, 0], [], []>} : vector<2x32xf32>, vector<8x32xf32>, vector<2x8xf32> -> vector<2x8xf32>
    %c0_15 = arith.constant 0 : index
    %c0_16 = arith.constant 0 : index
    %17 = vector.load %arg7[%c0_15, %c0_16] : memref<2x1xf32, #tpu.memory_space<vmem>>, vector<2x1xf32>
    %18 = vector.broadcast %17 : vector<2x1xf32> to vector<2x8xf32>
    %19 = arith.addf %16, %18 : vector<2x8xf32>
    %c0_17 = arith.constant 0 : index
    %c0_18 = arith.constant 0 : index
    %20 = vector.load %arg8[%c0_17, %c0_18] : memref<2x8xf32, #tpu.memory_space<vmem>>, vector<2x8xf32>
    tpu.vector_store %arg8[%c0_17, %c0_18], %19 {strides = array<i32>} : memref<2x8xf32, #tpu.memory_space<vmem>>, vector<2x8xf32>,
    return
  }
  func.func @transform_0(%arg0: i32) -> (i32, i32) {
    %c0_i32 = arith.constant 0 : i32
    %c0_i32_0 = arith.constant 0 : i32
    return %arg0, %c0_i32 : i32, i32
  }
  func.func @transform_1(%arg0: i32) -> (i32, i32) {
    %c0_i32 = arith.constant 0 : i32
    %c0_i32_0 = arith.constant 0 : i32
    %c0_i32_1 = arith.constant 0 : i32
    return %c0_i32, %c0_i32_0 : i32, i32
  }
  func.func @transform_2(%arg0: i32) -> (i32, i32) {
    %c0_i32 = arith.constant 0 : i32
    %c0_i32_0 = arith.constant 0 : i32
    %c0_i32_1 = arith.constant 0 : i32
    return %c0_i32, %c0_i32_0 : i32, i32
  }
  func.func @transform_3(%arg0: i32) -> (i32, i32) {
    %c0_i32 = arith.constant 0 : i32
    %c0_i32_0 = arith.constant 0 : i32
    %c0_i32_1 = arith.constant 0 : i32
    return %c0_i32, %c0_i32_0 : i32, i32
  }
  func.func @transform_4(%arg0: i32) -> (i32, i32) {
    %c0_i32 = arith.constant 0 : i32
    %c0_i32_0 = arith.constant 0 : i32
    %c0_i32_1 = arith.constant 0 : i32
    return %c0_i32, %c0_i32_0 : i32, i32
  }
  func.func @transform_5(%arg0: i32) -> (i32, i32) {
    %c0_i32 = arith.constant 0 : i32
    %c0_i32_0 = arith.constant 0 : i32
    %c0_i32_1 = arith.constant 0 : i32
    return %c0_i32, %c0_i32_0 : i32, i32
  }
  func.func @transform_6(%arg0: i32) -> (i32, i32) {
    %c0_i32 = arith.constant 0 : i32
    %c0_i32_0 = arith.constant 0 : i32
    %c0_i32_1 = arith.constant 0 : i32
    return %c0_i32, %c0_i32_0 : i32, i32
  }
  func.func @transform_7(%arg0: i32) -> (i32, i32) {
    %c0_i32 = arith.constant 0 : i32
    %c0_i32_0 = arith.constant 0 : i32
    return %c0_i32, %arg0 : i32, i32
  }
}

</mosaic_0001>

<bundles_post_ra>
// kernel: tpu_custom_call.1
= control target key start
LH: loop header
LB: loop body
LE: loop exit
PB: predicated region body
PF: predicated region fallthrough
CT: control target
= control target key end

     0   :  { %v440_v3 = vmov 0.0|0.0   ;;  %vm441_vm0 = vmmov 0   ;;  %v442_v6 = vmov 0.0   ;;  %s566_s0 = inlined_call_operand.vmem [shape: f32[8,66], index: 0, kind: input, shape index: {}]   ;;  %s567_s1 = inlined_call_operand.vmem [shape: f32[66,64], index: 1, kind: input, shape index: {}]   ;;  %s568_s2 = inlined_call_operand.vmem [shape: f32[1,64], index: 2, kind: input, shape index: {}]   ;;  %s569_s3 = inlined_call_operand.vmem [shape: f32[64,32], index: 3, kind: input, shape index: {}]   ;;  %s570_s4 = inlined_call_operand.vmem [shape: f32[1,32], index: 4, kind: input, shape index: {}]   ;;  %s571_s5 = inlined_call_operand.vmem [shape: f32[2,32], index: 5, kind: input, shape index: {}]   ;;  %s572_s6 = inlined_call_operand.vmem [shape: f32[2,1], index: 6, kind: input, shape index: {}]   ;;  %s573_s7 = inlined_call_operand.hbm [shape: f32[2,8], index: 7, kind: output, shape index: {}]  }
   0x1   :  { %v28_v0 = vld [vmem:[%s567_s1] sm:$0xff]  ;;  %v29_v1 = vld [vmem:[%s567_s1 + $0x8] sm:$0xff]  ;;  %v30_v2 = vld [vmem:[%s567_s1 + $0x10] sm:$0xff]  ;;  %386 = vmatprep.subr.bf16.mxu0 %v440_v3  ;;  %398 = vmatprep.subr.bf16.mxu1 %v440_v3 }
   0x2   :  { %v387_v4 = vpack.c.bf16 %v29_v1, %v28_v0  ;;  %v31_v5 = vld [vmem:[%s567_s1 + $0x18] sm:$0xff]  ;;  %359 = vmatprep.mubr.msk.f32.mxu0 %vm441_vm0, %v442_v6  ;;  %378 = vmatprep.mubr.msk.f32.mxu1 %vm441_vm0, %v442_v6  ;;  %v32_v8 = vld [vmem:[%s567_s1 + $0x20] sm:$0xff]  ;;  %v124_v10 = vld [vmem:[%s569_s3 + $0x8] sm:$0xff] }
   0x3   :  { %v390_v7 = vpack.c.bf16 %v31_v5, %v30_v2  ;;  %v123_v9 = vld [vmem:[%s569_s3] sm:$0xff]  ;;  %v33_v11 = vld [vmem:[%s567_s1 + $0x28] sm:$0xff]  ;;  %v125_v13 = vld [vmem:[%s569_s3 + $0x10] sm:$0xff] }
   0x4   :  { %388 = vmatpush3.bf16.msra.mxu0 %v387_v4  ;;  %v399_v12 = vpack.c.bf16 %v124_v10, %v123_v9  ;;  %v126_v14 = vld [vmem:[%s569_s3 + $0x18] sm:$0xff] }
   0x5   :  { %389 = vmatprep.subr.bf16.mxu0 %v440_v3 }
   0x6   :  { %12 = vsyncpa [#allocation3], 0  ;;  %400 = vmatpush3.bf16.msra.mxu1 %v399_v12  ;;  %v402_v15 = vpack.c.bf16 %v126_v14, %v125_v13  ;;  %v393_v16 = vpack.c.bf16 %v33_v11, %v32_v8  ;;  %v127_v17 = vld [vmem:[%s569_s3 + $0x20] sm:$0xff]  ;;  %v128_v18 = vld [vmem:[%s569_s3 + $0x28] sm:$0xff]  ;;  %vm48_vm1 = vcmask 1041408   ;;  %vm44_vm2 = vcmask 539648  }
   0x7   :  { %401 = vmatprep.subr.bf16.mxu1 %v440_v3  ;;  %v34_v19 = vld [vmem:[%s567_s1 + $0x30] sm:$0xff]  ;;  %v35_v20 = vld [vmem:[%s567_s1 + $0x38] sm:$0xff]  ;;  %v405_v21 = vpack.c.bf16 %v128_v18, %v127_v17  ;;  %v36_v23 = vld [vmem:[%s567_s1 + $0x40] sm:$0x3]  ;;  %vm138_vm3 = vcmask 523264   ;;  %v443_v34 = vmov 0  }
   0x8   :  { %391 = vmatpush3.bf16.msra.mxu0 %v390_v7  ;;  %v396_v22 = vpack.c.bf16 %v35_v20, %v34_v19  ;;  %v27_v24 = vld [vmem:[%s566_s0] sm:$0xff]  ;;  %v129_v25 = vld [vmem:[%s569_s3 + $0x30] sm:$0xff]  ;;  %v130_v26 = vld [vmem:[%s569_s3 + $0x38] sm:$0xff]  ;;  %415 = vset.pattern.permute.xlu0 %v443_v34  ;;  %vm220_vm4 = vcmask 261120   ;;  %vm297_vm5 = vcmask 58368  }
   0x9   :  { %392 = vmatprep.subr.bf16.mxu0 %v440_v3  ;;  %v408_v27 = vpack.c.bf16 %v130_v26, %v129_v25  ;;  %v313_v28 = vld [vmem:[%s568_s2] ss:$0 sm:$0xff] }
   0xa   :  { %403 = vmatpush3.bf16.msra.mxu1 %v402_v15  ;;  %v214_v33 = vld [vmem:[%s572_s6] sm:$0x3]  ;;  %s444_s6 = smov [#allocation2]  }
   0xb   :  { %404 = vmatprep.subr.bf16.mxu1 %v440_v3  ;;  %217 = vperm.xlu0 %415, %v214_v33   ;;  %v316_v35 = vld [vmem:[%s570_s4] ss:$0 sm:$0xff]  ;;  %s305_s18 = sshll.u32 %s444_s6, 4  ;;  %s306_s18 = int_to_ptr.vmem [resolvable:$true] %s305_s18 }
   0xc   :  { %394 = vmatpush3.bf16.msra.mxu0 %v393_v16  ;;  %v213_v40 = vld [vmem:[%s571_s5] sm:$0x3]  ;;  %s416_s4 = scalar_lea.vmem %s306_s18, 32  ;;  %p421_p1 = scmp.lt.s32.totalorder %s306_s18, %s306_s18 }
   0xd   :  { %395 = vmatprep.subr.bf16.mxu0 %v440_v3  ;;  %p417_p0 = scmp.ne.s32.totalorder %s306_s18, %s416_s4  ;;  %p422_p2 = scmp.lt.s32.totalorder %s416_s4, %s416_s4 }
   0xe   :  { %406 = vmatpush3.bf16.msra.mxu1 %v405_v21 }
   0xf   :  { %407 = vmatprep.subr.bf16.mxu1 %v440_v3  ;;  %p423_p3 = por %p422_p2, %p421_p1 }
  0x10   :  { %397 = vmatpush3.bf16.msra.mxu0 %v396_v22 }
  0x11   :  { %357 = vmatprep.subr.mxu0 %v442_v6  ;;  %p424_p4 = pnand %p423_p3, %p417_p0 }
  0x12   :  { %409 = vmatpush3.bf16.msra.mxu1 %v408_v27 }
  0x13   :  { %381 = vmatprep.subr.mxu1 %v442_v6 }
  0x14   :  { %358 = vmatpush3.msk.msra.mxu0 %vm48_vm1, %v36_v23 }
  0x15   :  { %360 = vmatmul.mubr.msk.f32.vlgmr.msra.gmra.mrb[0].mxu0 %vm44_vm2, %v27_v24 }
  0x8a   :  { %v218_v41 = vpop.permute.xlu0 %217 }
  0xe8   :  { %v118_v29 = vpop.f32.mrb[0].mxu0 }
  0xe9   :  { %v119_v30 = vadd.f32 %v313_v28, %v118_v29  ;;  %v361_v31 = vpop.f32.mrb[1].mxu0 }
  0xeb   :  { %v122_v32 = vmax.f32 %v119_v30, 0.0 }
  0xed   :  { %379 = vmatmul.mubr.msk.f32.vlgmr.msra.gmra.mrb[0].mxu1 %vm138_vm3, %v122_v32 }
  0xee   :  { %383 = vmatprep.mubr.msk.f32.mxu1 %vm441_vm0, %v442_v6 }
 0x1c0   :  { %v208_v36 = vpop.f32.mrb[0].mxu1 }
 0x1c1   :  { %v209_v37 = vadd.f32 %v316_v35, %v208_v36  ;;  %v380_v38 = vpop.f32.mrb[1].mxu1 }
 0x1c3   :  { %v212_v39 = vmax.f32 %v209_v37, 0.0 }
 0x1c5   :  { %382 = vmatpush3.xpose.msk.msra.mxu1 %vm220_vm4, %v212_v39 }
 0x1c8   :  { %384 = vmatmul.mubr.msk.f32.vlgmr.msra.gmra.mrb[2].mxu1 %vm220_vm4, %v213_v40 }
 0x29b   :  { %v293_v42 = vpop.f32.mrb[2].mxu1 }
 0x29c   :  { %v294_v43 = vadd.f32 %v293_v42, %v218_v41  ;;  %v385_v44 = vpop.f32.mrb[3].mxu1 }
 0x29e   :  { %298 = vst.msk [vmem:[#allocation2] sm:$0x3] %vm297_vm5, %v294_v43 }
 0x29f   :  { %427 = shalt.err (!%p424_p4)
}
 0x2a0   :  { %s428_s5 = scalar_lea.hbm %s573_s7, 32 }
 0x2a1   :  { %p429_p5 = scmp.ne.s32.totalorder %s573_s7, %s428_s5  ;;  %p432_p6 = scmp.lt.u32.totalorder %s428_s5, %s573_s7 }
 0x2a3   :  { %p434_p7 = pnand %p432_p6, %p429_p5 }
 0x2a5   :  { %437 = shalt.err (!%p434_p7)
}
 0x2a6   :  { %308 = dma.vmem_to_hbm [thread:$0]  %s306_s18, 32, %s573_s7, [#allocation3]  }
 0x2a7   :  { %438 = dma.done.wait [#allocation3], 32  }
 0x2a8   :  { %439 = vsyncadd [#allocation3], 4294967264 }
 0x2a9   :  { %312 = vsyncpa [#allocation3], 1 }

</bundles_post_ra>
